<compile_context>
chip_gen: v6e
topology: v6e:2x2x1
jax: 0.10.0
libtpu: 0.0.40
codegen_flags: <defaults>
</compile_context>

<pallas_src>
import math
from functools import partial

import jax
import jax.numpy as jnp
from jax.experimental import pallas as pl
from jax.experimental.pallas import tpu as pltpu

_TWO_PI = 2.0 * math.pi


def _subject_block_kernel(sid_ref, x_ref, loc_ref, z_ref, w_ref, b_ref, out_ref,
                          attn_ref, *, n_harmonics):
    """One (batch element, S tile) grid step.

    sid_ref : SMEM (B,)     scalar-prefetched subject ids (used by index_maps only)
    x_ref   : (1, C, tS)    input tile (S on lanes), bf16/f32
    loc_ref : (1, 2, C)     sensor (x, y) locations, f32
    z_ref   : (D0, 2*K2)    fused Fourier coefficients [z_re | z_im], f32
    w_ref   : (1, D2, D0)   fused per-subject weight (pre-transposed), bf16/f32
    b_ref   : (1, D2, 1)    fused per-subject bias, f32
    out_ref : (1, D2, tS)   output tile (S on lanes)
    attn_ref: VMEM (D0, C)  softmax attention over sensors (scratch, f32)
    """
    del sid_ref  # consumed by the BlockSpec index_maps only
    K = n_harmonics
    K2 = K * K
    C = x_ref.shape[1]

    # ---- SpatialAttention: compute once per batch element (first S tile only) ----
    @pl.when(pl.program_id(1) == 0)
    def _():
        idx = jax.lax.broadcasted_iota(jnp.int32, (K2, C), 0)
        # Exact k = idx // K, l = idx % K via compare/add (no vector int division).
        kk_i = jnp.zeros_like(idx)
        for j in range(1, K):
            kk_i = kk_i + (idx >= j * K).astype(jnp.int32)
        ll_i = idx - K * kk_i
        kk = kk_i.astype(jnp.float32)
        ll = ll_i.astype(jnp.float32)

        loc = loc_ref[0]                                                # (2, C)
        ang = _TWO_PI * (kk * loc[0:1, :] + ll * loc[1:2, :])           # (K2, C)
        basis = jnp.concatenate([jnp.cos(ang), jnp.sin(ang)], axis=0)   # (2*K2, C)

        logits = jnp.dot(z_ref[...], basis,
                         preferred_element_type=jnp.float32)            # (D0, C)
        m = jnp.max(logits, axis=-1, keepdims=True)
        e = jnp.exp(logits - m)
        denom = jnp.sum(e, axis=-1, keepdims=True)
        attn_ref[...] = e * pl.reciprocal(denom, approx=True)           # (D0, C)

    # ---- Weighted sum over sensors: (D0, C) @ (C, tS) -> (D0, tS) ----
    x_t = x_ref[0]                                                      # (C, tS)
    attn = attn_ref[...].astype(x_t.dtype)
    sa = jnp.dot(attn, x_t, preferred_element_type=jnp.float32)         # f32

    # ---- Fused Conv1d(1x1) + SubjectLayer: (D2, D0) @ (D0, tS) -> (D2, tS) ----
    w_t = w_ref[0]                                                      # (D2, D0)
    out = jnp.dot(w_t, sa.astype(w_t.dtype),
                  preferred_element_type=jnp.float32)                   # f32
    out_ref[0] = (out + b_ref[0]).astype(out_ref.dtype)


def _choose_seq_tile(S, target):
    """Largest multiple of 128 <= target that divides S; else the full S."""
    t = (min(int(target), S) // 128) * 128
    while t >= 128:
        if S % t == 0:
            return t
        t -= 128
    return S


def subject_block(x, locations, subject_id, params, *, seq_tile=1024,
                  mxu_dtype=jnp.bfloat16, vmem_limit_bytes=48 * 1024 * 1024):
    """x: (B, S, C_in) f32; locations: (B, C_in, 2) f32; subject_id: (B,) int."""
    B, S, C = x.shape
    z_re, z_im, w1, b1, ws = (
        params["z_re"], params["z_im"], params["w1"], params["b1"], params["ws"]
    )
    D0, K, _ = z_re.shape
    n_subjects, D1, D2 = ws.shape
    assert w1.shape == (D1, D1) and D1 == D0, "module requires D0 == D1"
    K2 = K * K

    # Fused Fourier coefficients: [z_re | z_im] -> one (D0, 2*K2) matmul in-kernel.
    z = jnp.concatenate([z_re.reshape(D0, K2), z_im.reshape(D0, K2)], axis=1)

    # Fuse Conv1d(1x1) + SubjectLayer into one per-subject (D0 -> D2) map + bias,
    # stored transposed (D2, D0) so the kernel needs no in-kernel transpose.
    # Not duplicated per batch element; selected via the scalar-prefetched sid.
    w_t = jnp.einsum("jo,sjm->smo", w1, ws).astype(mxu_dtype)   # (n_subjects, D2, D0)
    b_t = jnp.einsum("j,sjm->sm", b1, ws)[:, :, None]           # (n_subjects, D2, 1)

    # Lane-dense layouts: S on the lane axis for the big tensors.
    x_t = jnp.transpose(x, (0, 2, 1)).astype(mxu_dtype)         # (B, C, S)
    loc_t = jnp.transpose(locations, (0, 2, 1))                 # (B, 2, C)
    sid = subject_id.astype(jnp.int32)

    tS = _choose_seq_tile(S, seq_tile)
    grid = (B, S // tS)

    kernel = partial(_subject_block_kernel, n_harmonics=K)

    grid_spec = pltpu.PrefetchScalarGridSpec(
        num_scalar_prefetch=1,
        grid=grid,
        in_specs=[
            pl.BlockSpec((1, C, tS), lambda b, s, sid_ref: (b, 0, s)),       # x (B,C,S)
            pl.BlockSpec((1, 2, C), lambda b, s, sid_ref: (b, 0, 0)),        # locations^T
            pl.BlockSpec((D0, 2 * K2), lambda b, s, sid_ref: (0, 0)),        # Fourier coeffs
            pl.BlockSpec((1, D2, D0), lambda b, s, sid_ref: (sid_ref[b], 0, 0)),  # weight
            pl.BlockSpec((1, D2, 1), lambda b, s, sid_ref: (sid_ref[b], 0, 0)),   # bias
        ],
        out_specs=pl.BlockSpec((1, D2, tS), lambda b, s, sid_ref: (b, 0, s)),
        scratch_shapes=[pltpu.VMEM((D0, C), jnp.float32)],                   # attn cache
    )

    out_t = pl.pallas_call(
        kernel,
        out_shape=jax.ShapeDtypeStruct((B, D2, S), x.dtype),
        grid_spec=grid_spec,
        compiler_params=pltpu.CompilerParams(
            dimension_semantics=("parallel", "arbitrary"),
            vmem_limit_bytes=vmem_limit_bytes,
        ),
    )(sid, x_t, loc_t, z, w_t, b_t)

    return jnp.transpose(out_t, (0, 2, 1))                      # (B, S, D2)


def subject_block_ref(x, locations, subject_id, params):
    """Pure-JAX f32 reference implementing the original (unfused) module math."""
    z_re, z_im, w1, b1, ws = (
        params["z_re"], params["z_im"], params["w1"], params["b1"], params["ws"]
    )
    D0, K, _ = z_re.shape
    K2 = K * K
    kk, ll = jnp.meshgrid(jnp.arange(K), jnp.arange(K), indexing="ij")
    kvec = kk.reshape(K2).astype(jnp.float32)
    lvec = ll.reshape(K2).astype(jnp.float32)
    ang = 2.0 * math.pi * (
        kvec[None, :, None] * locations[:, None, :, 0]
        + lvec[None, :, None] * locations[:, None, :, 1]
    )
    logits = (
        jnp.einsum("ok,bkc->boc", z_re.reshape(D0, K2), jnp.cos(ang))
        + jnp.einsum("ok,bkc->boc", z_im.reshape(D0, K2), jnp.sin(ang))
    )
    attn = jax.nn.softmax(logits, axis=-1)                 # (B, D0, C)
    sa = jnp.einsum("btc,boc->bto", x, attn)               # (B, S, D0)
    y = jnp.einsum("bto,jo->btj", sa, w1) + b1             # (B, S, D1)
    out = jnp.einsum("btj,bjm->btm", y, ws[subject_id])    # (B, S, D2)
    return out


if __name__ == "__main__":
    # Module config (small, consistent with SubjectBlock.__init__)
    n_subjects = 3
    n_output_channels = (16, 16, 32)          # [sa out, conv1d in/out, subject-layer out]
    n_harmonics = 4
    drop_distance = 0.2                       # unused at inference (see TODO above)

    B, S, C_in = 2, 256, 8                    # batch, seq_len, n_input_channels (sensors)
    D0, D1, D2 = n_output_channels

    key = jax.random.PRNGKey(0)
    k_x, k_loc, k_zr, k_zi, k_w1, k_b1, k_ws, k_sid = jax.random.split(key, 8)

    x = jax.random.normal(k_x, (B, S, C_in), dtype=jnp.float32)
    locations = jax.random.uniform(k_loc, (B, C_in, 2), dtype=jnp.float32)
    subject_id = jax.random.randint(k_sid, (B,), 0, n_subjects, dtype=jnp.int32)

    params = {
        "z_re": 0.1 * jax.random.normal(k_zr, (D0, n_harmonics, n_harmonics), jnp.float32),
        "z_im": 0.1 * jax.random.normal(k_zi, (D0, n_harmonics, n_harmonics), jnp.float32),
        "w1": 0.1 * jax.random.normal(k_w1, (D1, D1), jnp.float32),   # Conv1d(D1, D1, ks=1)
        "b1": 0.1 * jax.random.normal(k_b1, (D1,), jnp.float32),
        "ws": 0.1 * jax.random.normal(k_ws, (n_subjects, D1, D2), jnp.float32),
    }

    # seq_tile=128 -> 2 S tiles per batch element: exercises the pipelined S axis.
    out = subject_block(x, locations, subject_id, params, seq_tile=128)
    out = jax.block_until_ready(out)

    ref = subject_block_ref(x, locations, subject_id, params)
    assert out.shape == (B, S, D2), out.shape
    # bf16 MXU operands with f32 accumulation (+ approx reciprocal in the softmax):
    # validate against the f32 reference at a bf16-appropriate tolerance.
    assert jnp.allclose(out, ref, rtol=5e-3, atol=5e-3), float(jnp.max(jnp.abs(out - ref)))

    print("KERNEL_OK")
</pallas_src>

<mosaic_0001>
module attributes {stable_mosaic.version = 11 : i64} {
  func.func @_subject_block_kernel(%arg0: i32, %arg1: i32, %arg2: memref<2xi32, #tpu.memory_space<smem>>, %arg3: memref<1x8x128xbf16, #tpu.memory_space<vmem>>, %arg4: memref<1x2x8xf32, #tpu.memory_space<vmem>>, %arg5: memref<16x32xf32, #tpu.memory_space<vmem>>, %arg6: memref<1x32x16xbf16, #tpu.memory_space<vmem>>, %arg7: memref<1x32x1xf32, #tpu.memory_space<vmem>>, %arg8: memref<1x32x128xf32, #tpu.memory_space<vmem>>, %arg9: memref<16x8xf32, #tpu.memory_space<vmem>>) attributes {dimension_semantics = [#tpu.dimension_semantics<parallel>, #tpu.dimension_semantics<arbitrary>], iteration_bounds = array<i64: 2, 2>, scalar_prefetch = 1 : i64, scratch_operands = 1 : i64, tpu.core_type = #tpu.core_type<tc>, window_params = [{transform_indices = @transform_0, window_bounds = array<i64: 1, 8, 128>}, {transform_indices = @transform_1, window_bounds = array<i64: 1, 2, 8>}, {pipeline_mode = #tpu.pipeline_mode<synchronous>, transform_indices = @transform_2, window_bounds = array<i64: 16, 32>}, {transform_indices = @transform_3, window_bounds = array<i64: 1, 32, 16>}, {transform_indices = @transform_4, window_bounds = array<i64: 1, 32, 1>}, {transform_indices = @transform_5, window_bounds = array<i64: 1, 32, 128>}]} {
    %c0_i32 = arith.constant 0 : i32
    %0 = arith.cmpi eq, %arg1, %c0_i32 : i32
    %1 = arith.extui %0 : i1 to i32
    %c0_i32_0 = arith.constant 0 : i32
    %2 = arith.cmpi ne, %1, %c0_i32_0 : i32
    scf.if %2 {
      %19 = tpu.iota {dimensions = array<i32: 0>} : vector<16x8xi32>
      %c0_i32_15 = arith.constant 0 : i32
      %20 = vector.broadcast %c0_i32_15 : i32 to vector<16x8xi32>
      %c4_i32 = arith.constant 4 : i32
      %21 = vector.broadcast %c4_i32 : i32 to vector<16x8xi32>
      %22 = arith.cmpi sge, %19, %21 : vector<16x8xi32>
      %23 = arith.extui %22 : vector<16x8xi1> to vector<16x8xi32>
      %24 = arith.addi %20, %23 : vector<16x8xi32>
      %c8_i32 = arith.constant 8 : i32
      %25 = vector.broadcast %c8_i32 : i32 to vector<16x8xi32>
      %26 = arith.cmpi sge, %19, %25 : vector<16x8xi32>
      %27 = arith.extui %26 : vector<16x8xi1> to vector<16x8xi32>
      %28 = arith.addi %24, %27 : vector<16x8xi32>
      %c12_i32 = arith.constant 12 : i32
      %29 = vector.broadcast %c12_i32 : i32 to vector<16x8xi32>
      %30 = arith.cmpi sge, %19, %29 : vector<16x8xi32>
      %31 = arith.extui %30 : vector<16x8xi1> to vector<16x8xi32>
      %32 = arith.addi %28, %31 : vector<16x8xi32>
      %c4_i32_16 = arith.constant 4 : i32
      %33 = vector.broadcast %c4_i32_16 : i32 to vector<16x8xi32>
      %34 = arith.muli %33, %32 : vector<16x8xi32>
      %35 = arith.subi %19, %34 : vector<16x8xi32>
      %36 = arith.sitofp %32 : vector<16x8xi32> to vector<16x8xf32>
      %37 = arith.sitofp %35 : vector<16x8xi32> to vector<16x8xf32>
      %c0_17 = arith.constant 0 : index
      %c0_18 = arith.constant 0 : index
      %c0_19 = arith.constant 0 : index
      %38 = vector.load %arg4[%c0_17, %c0_18, %c0_19] : memref<1x2x8xf32, #tpu.memory_space<vmem>>, vector<1x2x8xf32>
      %39 = vector.shape_cast %38 : vector<1x2x8xf32> to vector<2x8xf32>
      %40 = vector.extract_strided_slice %39 {offsets = [0, 0], sizes = [1, 8], strides = [1, 1]} : vector<2x8xf32> to vector<1x8xf32>
      %41 = vector.broadcast %40 : vector<1x8xf32> to vector<16x8xf32>
      %42 = arith.mulf %36, %41 : vector<16x8xf32>
      %43 = vector.extract_strided_slice %39 {offsets = [1, 0], sizes = [1, 8], strides = [1, 1]} : vector<2x8xf32> to vector<1x8xf32>
      %44 = vector.broadcast %43 : vector<1x8xf32> to vector<16x8xf32>
      %45 = arith.mulf %37, %44 : vector<16x8xf32>
      %46 = arith.addf %42, %45 : vector<16x8xf32>
      %cst_20 = arith.constant 6.28318548 : f32
      %47 = vector.broadcast %cst_20 : f32 to vector<16x8xf32>
      %48 = arith.mulf %47, %46 : vector<16x8xf32>
      %49 = math.cos %48 : vector<16x8xf32>
      %50 = math.sin %48 : vector<16x8xf32>
      %51 = tpu.concatenate %49, %50 in 0 : vector<16x8xf32>, vector<16x8xf32> -> vector<32x8xf32>
      %c0_21 = arith.constant 0 : index
      %c0_22 = arith.constant 0 : index
      %52 = vector.load %arg5[%c0_21, %c0_22] : memref<16x32xf32, #tpu.memory_space<vmem>>, vector<16x32xf32>
      %cst_23 = arith.constant dense<0.000000e+00> : vector<16x8xf32>
      %53 = tpu.matmul %52, %51, %cst_23 {dimension_numbers = #tpu.dot_dimension_numbers<[1], [0], [0], [1], [0, 0, 1, 1], [], []>} : vector<16x32xf32>, vector<32x8xf32>, vector<16x8xf32> -> vector<16x8xf32>
      %cst_24 = arith.constant dense<0xFF800000> : vector<16xf32>
      %54 = vector.multi_reduction <maximumf>, %53, %cst_24 [1] : vector<16x8xf32> to vector<16xf32>
      %55 = vector.shape_cast %54 : vector<16xf32> to vector<16x1xf32>
      %56 = vector.broadcast %55 : vector<16x1xf32> to vector<16x8xf32>
      %57 = arith.subf %53, %56 : vector<16x8xf32>
      %58 = math.exp %57 : vector<16x8xf32>
      %cst_25 = arith.constant dense<0.000000e+00> : vector<16xf32>
      %59 = vector.multi_reduction <add>, %58, %cst_25 [1] : vector<16x8xf32> to vector<16xf32>
      %60 = vector.shape_cast %59 : vector<16xf32> to vector<16x1xf32>
      %61 = tpu.reciprocal %60 {approx = true} : vector<16x1xf32> -> vector<16x1xf32>
      %62 = vector.broadcast %61 : vector<16x1xf32> to vector<16x8xf32>
      %63 = arith.mulf %58, %62 : vector<16x8xf32>
      %c0_26 = arith.constant 0 : index
      %c0_27 = arith.constant 0 : index
      %64 = vector.load %arg9[%c0_26, %c0_27] : memref<16x8xf32, #tpu.memory_space<vmem>>, vector<16x8xf32>
      tpu.vector_store %arg9[%c0_26, %c0_27], %63 {strides = array<i32>} : memref<16x8xf32, #tpu.memory_space<vmem>>, vector<16x8xf32>,
    } else {
    }
    %c0 = arith.constant 0 : index
    %c0_1 = arith.constant 0 : index
    %c0_2 = arith.constant 0 : index
    %3 = vector.load %arg3[%c0, %c0_1, %c0_2] : memref<1x8x128xbf16, #tpu.memory_space<vmem>>, vector<1x8x128xbf16>
    %4 = vector.shape_cast %3 : vector<1x8x128xbf16> to vector<8x128xbf16>
    %c0_3 = arith.constant 0 : index
    %c0_4 = arith.constant 0 : index
    %5 = vector.load %arg9[%c0_3, %c0_4] : memref<16x8xf32, #tpu.memory_space<vmem>>, vector<16x8xf32>
    %6 = arith.truncf %5 : vector<16x8xf32> to vector<16x8xbf16>
    %cst = arith.constant dense<0.000000e+00> : vector<16x128xf32>
    %7 = tpu.matmul %6, %4, %cst {dimension_numbers = #tpu.dot_dimension_numbers<[1], [0], [0], [1], [0, 0, 1, 1], [], []>} : vector<16x8xbf16>, vector<8x128xbf16>, vector<16x128xf32> -> vector<16x128xf32>
    %c0_5 = arith.constant 0 : index
    %c0_6 = arith.constant 0 : index
    %c0_7 = arith.constant 0 : index
    %8 = vector.load %arg6[%c0_5, %c0_6, %c0_7] : memref<1x32x16xbf16, #tpu.memory_space<vmem>>, vector<1x32x16xbf16>
    %9 = vector.shape_cast %8 : vector<1x32x16xbf16> to vector<32x16xbf16>
    %10 = arith.truncf %7 : vector<16x128xf32> to vector<16x128xbf16>
    %cst_8 = arith.constant dense<0.000000e+00> : vector<32x128xf32>
    %11 = tpu.matmul %9, %10, %cst_8 {dimension_numbers = #tpu.dot_dimension_numbers<[1], [0], [0], [1], [0, 0, 1, 1], [], []>} : vector<32x16xbf16>, vector<16x128xbf16>, vector<32x128xf32> -> vector<32x128xf32>
    %c0_9 = arith.constant 0 : index
    %c0_10 = arith.constant 0 : index
    %c0_11 = arith.constant 0 : index
    %12 = vector.load %arg7[%c0_9, %c0_10, %c0_11] : memref<1x32x1xf32, #tpu.memory_space<vmem>>, vector<1x32x1xf32>
    %13 = vector.shape_cast %12 : vector<1x32x1xf32> to vector<32x1xf32>
    %14 = vector.broadcast %13 : vector<32x1xf32> to vector<32x128xf32>
    %15 = arith.addf %11, %14 : vector<32x128xf32>
    %c0_12 = arith.constant 0 : index
    %c0_13 = arith.constant 0 : index
    %c0_14 = arith.constant 0 : index
    %16 = vector.load %arg8[%c0_12, %c0_13, %c0_14] : memref<1x32x128xf32, #tpu.memory_space<vmem>>, vector<1x32x128xf32>
    %17 = vector.shape_cast %16 : vector<1x32x128xf32> to vector<32x128xf32>
    %18 = vector.shape_cast %15 : vector<32x128xf32> to vector<1x32x128xf32>
    tpu.vector_store %arg8[%c0_12, %c0_13, %c0_14], %18 {strides = array<i32>} : memref<1x32x128xf32, #tpu.memory_space<vmem>>, vector<1x32x128xf32>,
    return
  }
  func.func @transform_0(%arg0: i32, %arg1: i32, %arg2: memref<2xi32, #tpu.memory_space<smem>>) -> (i32, i32, i32) {
    %c0_i32 = arith.constant 0 : i32
    %c0_i32_0 = arith.constant 0 : i32
    return %arg0, %c0_i32, %arg1 : i32, i32, i32
  }
  func.func @transform_1(%arg0: i32, %arg1: i32, %arg2: memref<2xi32, #tpu.memory_space<smem>>) -> (i32, i32, i32) {
    %c0_i32 = arith.constant 0 : i32
    %c0_i32_0 = arith.constant 0 : i32
    %c0_i32_1 = arith.constant 0 : i32
    return %arg0, %c0_i32, %c0_i32_0 : i32, i32, i32
  }
  func.func @transform_2(%arg0: i32, %arg1: i32, %arg2: memref<2xi32, #tpu.memory_space<smem>>) -> (i32, i32) {
    %c0_i32 = arith.constant 0 : i32
    %c0_i32_0 = arith.constant 0 : i32
    %c0_i32_1 = arith.constant 0 : i32
    return %c0_i32, %c0_i32_0 : i32, i32
  }
  func.func @transform_3(%arg0: i32, %arg1: i32, %arg2: memref<2xi32, #tpu.memory_space<smem>>) -> (i32, i32, i32) {
    %0 = arith.index_cast %arg0 : i32 to index
    %1 = memref.load %arg2[%0] : memref<2xi32, #tpu.memory_space<smem>>
    %c0_i32 = arith.constant 0 : i32
    %c0_i32_0 = arith.constant 0 : i32
    %c0_i32_1 = arith.constant 0 : i32
    return %1, %c0_i32, %c0_i32_0 : i32, i32, i32
  }
  func.func @transform_4(%arg0: i32, %arg1: i32, %arg2: memref<2xi32, #tpu.memory_space<smem>>) -> (i32, i32, i32) {
    %0 = arith.index_cast %arg0 : i32 to index
    %1 = memref.load %arg2[%0] : memref<2xi32, #tpu.memory_space<smem>>
    %c0_i32 = arith.constant 0 : i32
    %c0_i32_0 = arith.constant 0 : i32
    %c0_i32_1 = arith.constant 0 : i32
    return %1, %c0_i32, %c0_i32_0 : i32, i32, i32
  }
  func.func @transform_5(%arg0: i32, %arg1: i32, %arg2: memref<2xi32, #tpu.memory_space<smem>>) -> (i32, i32, i32) {
    %c0_i32 = arith.constant 0 : i32
    %c0_i32_0 = arith.constant 0 : i32
    return %arg0, %c0_i32, %arg1 : i32, i32, i32
  }
}

</mosaic_0001>

<bundles_post_ra>
// kernel: tpu_custom_call.1
= control target key start
LH: loop header
LB: loop body
LE: loop exit
PB: predicated region body
PF: predicated region fallthrough
CT: control target
= control target key end

     0   :  { %s1812_s0 = inlined_call_operand.vmem [shape: s32[2], index: 0, kind: input, shape index: {}]   ;;  %s1813_s1 = inlined_call_operand.vmem [shape: bf16[2,8,256], index: 1, kind: input, shape index: {}]   ;;  %s1814_s2 = inlined_call_operand.vmem [shape: f32[2,2,8], index: 2, kind: input, shape index: {}]   ;;  %s1815_s3 = inlined_call_operand.vmem [shape: f32[16,32], index: 3, kind: input, shape index: {}]   ;;  %s1816_s4 = inlined_call_operand.vmem [shape: bf16[3,32,16], index: 4, kind: input, shape index: {}]   ;;  %s1817_s5 = inlined_call_operand.vmem [shape: f32[3,32,1], index: 5, kind: input, shape index: {}]   ;;  %s1818_s6 = inlined_call_operand.hbm [shape: f32[2,32,256], index: 6, kind: output, shape index: {}]  }
   0x1   :  { %s11_s23 = sshll.u32 %s1812_s0, 4  ;;  %s12_s23 = int_to_ptr.vmem [resolvable:$true] %s11_s23 }
   0x2   :  { %s1375_s24 = scalar_lea.vmem %s12_s23, 16  ;;  %p1380_p1 = scmp.lt.s32.totalorder %s12_s23, %s12_s23 }
   0x3   :  { %p1376_p0 = scmp.ne.s32.totalorder %s12_s23, %s1375_s24  ;;  %p1381_p2 = scmp.lt.s32.totalorder %s1375_s24, %s1375_s24 }
   0x5   :  { %p1382_p3 = por %p1381_p2, %p1380_p1 }
   0x7   :  { %p1383_p4 = pnand %p1382_p3, %p1376_p0 }
   0x9   :  { %1386 = shalt.err (!%p1383_p4)  }
   0xa   :  { %s1483_s25 = smov [#allocation4]  }
   0xb   :  { %14 = dma.vmem_to_smem %s12_s23, 16, %s1483_s25, [#allocation3] }
   0xc   :  { %1445 = dma.done.wait [#allocation3], 16 }
   0xd   :  { %1446 = vsyncadd [#allocation3], 4294967280 }
   0xe   :  { %16 = sfence }
   0xf   :  { %17 = vsyncpa [#allocation6], 0 }
  0x10   :  { %19 = vsyncpa [#allocation6 + $0x1], 0  ;;  %s1537_s26 = smov 0   ;;  %s1539_s27 = smov 0  }
  0x11   :  { %s1541_s0 = smov 0   ;;  %s1543_s28 = smov 0  }
  0x12   :  { %s1545_s29 = smov 0   ;;  %s1547_s30 = smov 0  }
  0x13   :  { %s1549_s7 = smov 0   ;;  %s1551_s8 = smov 0  }
  0x14 LB: > { %1825 = sst [smem:[#allocation9_spill]] %s1461_s0  ;;  %s1182_s9 = sadd.s32 4294967295, %s1481_s8   ;;  %s1481_s8 = sphi %s1551_s8, %s25_s8   ;;  %s1477_s7 = sphi %s1549_s7, %s1839_s7   ;;  %s1473_s30 = sphi %s1547_s30, %s1838_s30   ;;  %s1469_s29 = sphi %s1545_s29, %s1842_s29   ;;  %s1465_s28 = sphi %s1543_s28, %s1836_s28   ;;  %s1461_s0 = sphi %s1541_s0, %s1835_s0   ;;  %s1457_s27 = sphi %s1539_s27, %s1841_s27   ;;  %s1453_s26 = sphi %s1537_s26, %s1840_s26  }
  0x15   : > { %1826 = sst [smem:[#allocation10_spill]] %s1473_s30  ;;  %s1183_s10 = sadd.s32 4294967294, %s1481_s8  }
  0x16   : > { %1827 = sst [smem:[#allocation11_spill]] %s1477_s7  ;;  %s34_s11 = sadd.s32 1, %s1473_s30 }
  0x17   : > { %p35_p5 = scmp.ge.s32.totalorder %s34_s11, 2  ;;  %s37_s12 = sadd.s32 1, %s1477_s7 }
  0x18   : > { %p187_p6 = scmp.ne.s32.totalorder %s1461_s0, %s1457_s27  ;;  %p188_p7 = scmp.eq.s32.totalorder %s1182_s9, 3 }
  0x19   : > { %s1844_s11 = smov (%p35_p5, %s34_s11), 0  ;;  %s1846_s12 = smov (!%p35_p5, %s37_s12), %s1477_s7 }
  0x1a   : > { %1828 = sst [smem:[#allocation12_spill]] %s1844_s11  ;;  %s173_s13 = ssub.s32 %s1473_s30, %s1844_s11 }
  0x1b   : > { %p1588_p8 = por %p188_p7, %p187_p6  ;;  %p39_p9 = scmp.ge.s32.totalorder %s1846_s12, 2 }
  0x1c   : > { %p193_p10 = scmp.ne.s32.totalorder %s1457_s27, %s1453_s26  ;;  %p194_p11 = scmp.eq.s32.totalorder %s1183_s10, 3 }
  0x1d   : > { %p1186_p12 = scmp.ge.s32.totalorder %s1481_s8, 1  ;;  %s1848_s12 = smov (%p39_p9, %s1846_s12), 0 }
  0x1e   : > { %1830 = sst [smem:[#allocation13_spill]] %s1848_s12  ;;  %p1597_p13 = por %p194_p11, %p193_p10 }
  0x1f   : > { %p253_p0 = scmp.lt.s32.totalorder %s1481_s8, 5  ;;  %s172_s16 = ssub.s32 %s1477_s7, %s1848_s12 }
  0x20   : > { %s177_s17 = sadd.s32 1, %s1461_s0  ;;  %s174_s18 = sor.u32 %s173_s13, %s172_s16 }
  0x21   : > { %p254_p1 = pnand %p1186_p12, %p253_p0  ;;  %p175_p2 = scmp.eq.s32.totalorder %s174_s18, 0 }
  0x22   : > { %s1822_s20 = sand.u32 (!%p254_p1), 1, %s1457_s27   ;;  %p300_p3 = scmp.lt.s32.totalorder (!%p254_p1), %s1469_s29, 1 }
  0x23   : > { %s1606_s19 = scalar_select %p175_p2, %s1461_s0, %s177_s17  }
  0x24   : > { %257 = sbr.rel (%p254_p1) target bundleno = 1112 (0x458), region = 40  ;;  %s1187_s21 = sshll.u32 (!%p254_p1), %s1822_s20, 5 }
  0x25   : > { %1832 = sst [smem:[#allocation14_spill]] %s1606_s19  ;;  %p302_p4 = scmp.lt.s32.totalorder (!%p254_p1), %s1465_s28, 1 }
  0x26   : > { %s312_s22 = sld [smem:[#allocation4 + %s1469_s29]] (!%p254_p1)  ;;  %p1195_p7 = scmp.ne.s32.totalorder (!%p254_p1), %s1465_s28, 0 }
  0x27   : > { %s319_s9 = sld [smem:[#allocation4 + %s1469_s29]] (!%p254_p1) }
  0x29   : > { %s301_s23 = scalar_select %p300_p3, %s1469_s29, 1 }
  0x2a   : > { %s303_s24 = scalar_select %p302_p4, %s1465_s28, 1 }
  0x2b   : > { %s1188_s25 = sshll.u32 %s301_s23, 1 }
  0x2c   : > { %s305_s10 = sadd.s32 %s1188_s25, %s303_s24  ;;  %s311_s17 = scalar_lea.vmem %s1814_s2, %s1188_s25 }
  0x2d   : > { %s1189_s18 = sshll.u32 %s305_s10, 2  ;;  %p313_p5 = scmp.lt.s32.totalorder %s312_s22, 2 }
  0x2e   : > { %s1623_s7 = scalar_lea.vmem %s1813_s1, %s1189_s18  ;;  %p320_p6 = scmp.lt.s32.totalorder %s319_s9, 2 }
  0x2f   : > { %s1850_s22 = smov (!%p313_p5, %s312_s22), 2  ;;  %s1635_s10 = scalar_lea.vmem [#allocation5], %s1187_s21 }
  0x30   : > { %s1225_s20 = sshll.u32 %s1850_s22, 4  ;;  %s1852_s9 = smov (!%p320_p6, %s319_s9), 2 }
  0x31   : > { %s1628_s23 = scalar_lea.vmem %s1816_s4, %s1225_s20  ;;  %s1226_s24 = sshll.u32 %s1852_s9, 5 }
  0x32   : > { %s1633_s25 = scalar_lea.vmem %s1817_s5, %s1226_s24  ;;  %330 = sbr.rel (%p1195_p7) target bundleno = 684 (0x2ac), region = 44 }
  0x37   : > { %v331_v0 = vlaneseq  ;;  %v789_v2 = vld [vmem:[%s1815_s3] sm:$0xff]  ;;  %vm791_vm0 = vcmask 261120   ;;  %v1484_v7 = vmov 0   ;;  %v1485_v11 = vmov 0.0  }
  0x38   : > { %1246 = vmatprep.mubr.msk.f32.mxu0 %vm791_vm0, %v789_v2  ;;  %v358_v5 = vld [vmem:[%s311_s17] sm:$0x3]  ;;  %v1486_v50 = vmov 683565275   ;;  %v1487_v54 = vmov 2475754826  }
  0x39   : > { %v332_v1 = vshrl.u32 %v331_v0, 7  ;;  %v1488_v56 = vmov 2131351028   ;;  %v1489_v61 = vmov 2102212464  }
  0x3b   : > { %v333_v3 = vadd.s32 8, %v332_v1  ;;  %v361_v4 = vsub.s32 0, %v332_v1  ;;  %vm334_vm1 = vcmp.ge.s32.totalorder %v332_v1, 4  ;;  %v367_v6 = vsub.s32 1, %v332_v1 }
  0x3c   : > { %v336_v8 = vsel %vm334_vm1, 1, %v1484_v7  ;;  %v1196_v12 = vsel %vm334_vm1, 1.0, %v1485_v11 }
  0x3d   : > { %vm345_vm2 = vcmp.ge.s32.totalorder %v333_v3, 12  ;;  %v350_v9 = vmul.u32 4, %v336_v8  ;;  %v362_v14 = vrot.slane %v358_v5, %v361_v4  ;;  %v368_v16 = vrot.slane %v358_v5, %v367_v6 }
  0x3e   : > { %v347_v10 = vsel %vm345_vm2, 1, %v1484_v7  ;;  %v1490_v4 = vmov 920167782  }
  0x3f   : > { %v349_v13 = vadd.s32 2, %v347_v10  ;;  %v352_v15 = vsub.s32 %v332_v1, %v350_v9  ;;  %v363_v20 = vmul.f32 %v1196_v12, %v362_v14  ;;  %v1491_v12 = vmov 1326507024  }
  0x41   : > { %v351_v17 = vmul.u32 4, %v349_v13  ;;  %v355_v18 = vcvt.s32.f32 %v349_v13  ;;  %v356_v19 = vcvt.s32.f32 %v352_v15 }
  0x43   : > { %v353_v21 = vsub.s32 %v333_v3, %v351_v17  ;;  %v369_v22 = vmul.f32 %v368_v16, %v356_v19  ;;  %v364_v24 = vmul.f32 %v362_v14, %v355_v18 }
  0x45   : > { %v357_v23 = vcvt.s32.f32 %v353_v21  ;;  %v371_v25 = vadd.f32 %v369_v22, %v363_v20 }
  0x47   : > { %v370_v26 = vmul.f32 %v368_v16, %v357_v23  ;;  %v1642_v27 = vmul.f32 6.2831855, %v371_v25 }
  0x49   : > { %v372_v28 = vadd.f32 %v370_v26, %v364_v24  ;;  %v378_v29 = vand.u32 2139095040, %v1642_v27  ;;  %v375_v34 = vand.u32 2147483647, %v1642_v27 }
  0x4b   : > { %v1645_v30 = vmul.f32 6.2831855, %v372_v28  ;;  %v379_v31 = vshrl.u32 %v378_v29, 23  ;;  %v1654_v41 = vand.u32 8388607, %v375_v34 }
  0x4d   : > { %v478_v32 = vand.u32 2147483647, %v1645_v30  ;;  %v481_v33 = vand.u32 2139095040, %v1645_v30  ;;  %v1197_v35 = vadd.s32 4294967169, %v379_v31  ;;  %v383_v46 = vor.u32 8388608, %v1654_v41 }
  0x4e   : > { %vm480_vm2 = vcmp.lt.s32.totalorder %v1645_v30, 0 }
  0x4f   : > { %v482_v36 = vshrl.u32 %v481_v33, 23  ;;  %v485_v37 = vand.u32 8388607, %v478_v32  ;;  %v385_v38 = vadd.s32 1, %v1197_v35 }
  0x51   : > { %v1201_v39 = vadd.s32 4294967169, %v482_v36  ;;  %v486_v40 = vor.u32 8388608, %v485_v37  ;;  %vm386_vm3 = vcmp.gt.s32.totalorder %v385_v38, 0 }
  0x52   : > { %v387_v43 = vsel %vm386_vm3, %v385_v38, 0  ;;  %vm479_vm3 = vcmp.le.f32.partialorder %v478_v32, 0.7853982 }
  0x53   : > { %v488_v42 = vadd.s32 1, %v1201_v39  ;;  %v389_v44 = vand.u32 31, %v387_v43  ;;  %v1656_v45 = vshll.u32 %v486_v40, 8  ;;  %v1659_v48 = vshrl.u32 %v387_v43, 5 }
  0x55   : > { %vm489_vm4 = vcmp.gt.s32.totalorder %v488_v42, 0  ;;  %v390_v49 = vsub.s32 32, %v389_v44  ;;  %v392_v51 = vshll.u32 %v1486_v50, %v389_v44  ;;  %v395_v55 = vshll.u32 %v1487_v54, %v389_v44 }
  0x56   : > { %v490_v47 = vsel %vm489_vm4, %v488_v42, 0  ;;  %v398_v57 = vshll.u32 %v1488_v56, %v389_v44  ;;  %v401_v62 = vshll.u32 %v1489_v61, %v389_v44  ;;  %v404_v40 = vshll.u32 %v1490_v4, %v389_v44 }
  0x57   : > { %v491_v52 = vshrl.u32 %v490_v47, 5  ;;  %v492_v53 = vand.u32 31, %v490_v47  ;;  %v391_v58 = vshrl.u32 %v1486_v50, %v390_v49  ;;  %v393_v59 = vshrl.u32 %v1487_v54, %v390_v49 }
  0x58   : > { %v396_v60 = vshrl.u32 %v1488_v56, %v390_v49  ;;  %v399_v6 = vshrl.u32 %v1489_v61, %v390_v49  ;;  %v402_v29 = vshrl.u32 %v1490_v4, %v390_v49  ;;  %vm407_vm9 = vcmp.lt.s32.totalorder %v1659_v48, 1 }
  0x59   : > { %v493_v63 = vsub.s32 32, %v492_v53  ;;  %v495_v0 = vshll.u32 %v1486_v50, %v492_v53  ;;  %v498_v1 = vshll.u32 %v1487_v54, %v492_v53  ;;  %v501_v2 = vshll.u32 %v1488_v56, %v492_v53 }
  0x5a   : > { %v504_v3 = vshll.u32 %v1489_v61, %v492_v53  ;;  %v507_v5 = vshll.u32 %v1490_v4, %v492_v53  ;;  %vm510_vm5 = vcmp.lt.s32.totalorder %v491_v52, 1  ;;  %vm511_vm6 = vcmp.lt.s32.totalorder %v491_v52, 2 }
  0x5b   : > { %v494_v7 = vshrl.u32 %v1486_v50, %v493_v63  ;;  %v496_v8 = vshrl.u32 %v1487_v54, %v493_v63  ;;  %v499_v9 = vshrl.u32 %v1488_v56, %v493_v63  ;;  %v502_v10 = vshrl.u32 %v1489_v61, %v493_v63 }
  0x5c   : > { %v505_v11 = vshrl.u32 %v1490_v4, %v493_v63  ;;  %v508_v13 = vshrl.u32 %v1491_v12, %v493_v63  ;;  %vm512_vm7 = vcmp.lt.s32.totalorder %v491_v52, 3  ;;  %vm513_vm8 = vcmp.lt.s32.totalorder %v491_v52, 4 }
  0x5d   : > { %v497_v14 = vor.u32 %v496_v8, %v495_v0  ;;  %v500_v15 = vor.u32 %v499_v9, %v498_v1  ;;  %v503_v16 = vor.u32 %v502_v10, %v501_v2  ;;  %v394_v19 = vor.u32 %v393_v59, %v392_v51 }
  0x5e   : > { %v506_v17 = vor.u32 %v505_v11, %v504_v3  ;;  %v509_v18 = vor.u32 %v508_v13, %v507_v5  ;;  %v397_v20 = vor.u32 %v396_v60, %v395_v55  ;;  %v400_v36 = vor.u32 %v399_v6, %v398_v57 }
  0x5f   : > { %v514_v21 = vsel %vm510_vm5, %v494_v7, %v497_v14  ;;  %v515_v22 = vsel %vm513_vm8, %v503_v16, 2102212464  ;;  %v518_v23 = vsel %vm510_vm5, %v497_v14, %v500_v15  ;;  %v522_v24 = vsel %vm510_vm5, %v500_v15, %v503_v16 }
  0x60   : > { %v516_v25 = vsel %vm512_vm7, %v500_v15, %v515_v22  ;;  %v519_v26 = vsel %vm513_vm8, %v506_v17, 920167782  ;;  %v523_v28 = vsel %vm513_vm8, %v509_v18, 1326507024  ;;  %v403_v39 = vor.u32 %v402_v29, %v401_v62 }
  0x61   : > { %v517_v31 = vsel %vm511_vm6, %v514_v21, %v516_v25  ;;  %v520_v33 = vsel %vm512_vm7, %v503_v16, %v519_v26  ;;  %v524_v35 = vsel %vm512_vm7, %v506_v17, %v523_v28  ;;  %v405_v53 = vshrl.u32 %v1491_v12, %v390_v49 }
  0x62   : > { %v521_v37 = vsel %vm511_vm6, %v518_v23, %v520_v33  ;;  %v525_v38 = vsel %vm511_vm6, %v522_v24, %v524_v35  ;;  %v533_v51 = vmul.u32 %v1656_v45, %v517_v31  ;;  %v423_v54 = vshll.u32 %v383_v46, 8 }
  0x63   : > { %v1671_v42 = vmul.u32.u64.low %v1656_v45, %v525_v38  ;;  %v1672_v43 = vmul.u32.u64.high %v1656_v45, %v525_v38, %v1671_v42  ;;  %v1675_v47 = vmul.u32.u64.low %v1656_v45, %v521_v37  ;;  %v1676_v50 = vmul.u32.u64.high %v1656_v45, %v521_v37, %v1675_v47 }
  0x64   : > { %vm408_vm10 = vcmp.lt.s32.totalorder %v1659_v48, 2  ;;  %vm409_vm11 = vcmp.lt.s32.totalorder %v1659_v48, 3  ;;  %vm410_vm12 = vcmp.lt.s32.totalorder %v1659_v48, 4  ;;  %v411_v44 = vsel %vm407_vm9, %v391_v58, %v394_v19 }
  0x65   : > { %v406_v52 = vor.u32 %v405_v53, %v404_v40  ;;  %v412_v55 = vsel %vm410_vm12, %v400_v36, 2102212464  ;;  %v415_v56 = vsel %vm407_vm9, %v394_v19, %v397_v20  ;;  %v416_v57 = vsel %vm410_vm12, %v403_v39, 920167782 }
  0x66   : > { %vm535_vm13 = vc.u32 %v1672_v43, %v1675_v47  ;;  %v536_v45 = vadd.s32 1, %v1676_v50  ;;  %v413_v49 = vsel %vm409_vm11, %v397_v20, %v412_v55  ;;  %v419_v41 = vsel %vm407_vm9, %v397_v20, %v400_v36 }
  0x67   : > { %v417_v46 = vsel %vm409_vm11, %v400_v36, %v416_v57  ;;  %v420_v59 = vsel %vm410_vm12, %v406_v52, 1326507024  ;;  %v414_v58 = vsel %vm408_vm10, %v411_v44, %v413_v49  ;;  %v534_v21 = vadd.s32 %v1675_v47, %v1672_v43 }
  0x68   : > { %v537_v60 = vsel %vm535_vm13, %v536_v45, %v1676_v50  ;;  %v418_v61 = vsel %vm408_vm10, %v415_v56, %v417_v46  ;;  %v421_v62 = vsel %vm409_vm11, %v403_v39, %v420_v59  ;;  %v430_v6 = vmul.u32 %v423_v54, %v414_v58 }
  0x69   : > { %v538_v63 = vadd.s32 %v537_v60, %v533_v51  ;;  %v422_v0 = vsel %vm408_vm10, %v419_v41, %v421_v62  ;;  %v1700_v1 = vmul.u32.u64.low %v423_v54, %v418_v61  ;;  %v1701_v2 = vmul.u32.u64.high %v423_v54, %v418_v61, %v1700_v1 }
  0x6a   : > { %v1703_v3 = vmul.u32.u64.low %v423_v54, %v422_v0  ;;  %v1704_v4 = vmul.u32.u64.high %v423_v54, %v422_v0, %v1703_v3  ;;  %vm377_vm4 = vcmp.lt.s32.totalorder %v1642_v27, 0  ;;  %vm376_vm5 = vcmp.le.f32.partialorder %v375_v34, 0.7853982 }
  0x6b   : > { %v539_v5 = vadd.s32 536870912, %v538_v63  ;;  %v433_v8 = vadd.s32 1, %v1701_v2  ;;  %vm570_vm9 = vweird.f32 %v1645_v30 }
  0x6c   : > { %vm432_vm14 = vc.u32 %v1704_v4, %v1700_v1  ;;  %v431_v37 = vadd.s32 %v1700_v1, %v1704_v4 }
  0x6d   : > { %v540_v7 = vshrl.u32 %v539_v5, 30  ;;  %v434_v10 = vsel %vm432_vm14, %v433_v8, %v1701_v2 }
  0x6e   : > { %v435_v11 = vadd.s32 %v434_v10, %v430_v6 }
  0x6f   : > { %v541_v9 = vshll.u32 %v540_v7, 30  ;;  %v564_v44 = vsub.s32 4, %v540_v7 }
  0x70   : > { %v436_v48 = vadd.s32 536870912, %v435_v11 }
  0x71   : > { %v542_v12 = vsub.s32 %v538_v63, %v541_v9  ;;  %v565_v41 = vsel %vm480_vm2, %v564_v44, %v540_v7 }
  0x72   : > { %v437_v14 = vshrl.u32 %v436_v48, 30  ;;  %v567_v58 = vsel %vm479_vm3, 0, %v565_v41 }
  0x73   : > { %v544_v13 = vsub.s32 0, %v542_v12  ;;  %v778_v32 = vadd.s32 3, %v567_v58  ;;  %v571_v6 = vand.u32 3, %v567_v58 }
  0x74   : > { %v438_v16 = vshll.u32 %v437_v14, 30  ;;  %v461_v61 = vsub.s32 4, %v437_v14 }
  0x75   : > { %v1202_v15 = vmin.u32 %v544_v13, %v542_v12  ;;  %v779_v2 = vand.u32 3, %v778_v32  ;;  %vm573_vm10 = vcmp.eq.s32.totalorder %v571_v6, 0  ;;  %vm576_vm11 = vcmp.eq.s32.totalorder %v571_v6, 2 }
  0x76   : > { %v439_v18 = vsub.s32 %v435_v11, %v438_v16  ;;  %v462_v0 = vsel %vm377_vm4, %v461_v61, %v437_v14  ;;  %vm572_vm12 = vcmp.lt.s32.totalorder %v571_v6, 2 }
  0x77   : > { %v546_v17 = vclz %v1202_v15  ;;  %v464_v3 = vsel %vm376_vm5, 0, %v462_v0  ;;  %vm784_vm6 = vcmp.eq.s32.totalorder %v779_v2, 2  ;;  %vm781_vm7 = vcmp.eq.s32.totalorder %v779_v2, 0 }
  0x78   : > { %v441_v20 = vsub.s32 0, %v439_v18  ;;  %v674_v4 = vadd.s32 3, %v464_v3  ;;  %vm780_vm8 = vcmp.lt.s32.totalorder %v779_v2, 2  ;;  %v468_v11 = vand.u32 3, %v464_v3 }
  0x79   : > { %v1203_v19 = vadd.s32 4294967294, %v546_v17 }
  0x7a   : > { %v1198_v23 = vmin.u32 %v441_v20, %v439_v18  ;;  %v675_v10 = vand.u32 3, %v674_v4  ;;  %vm473_vm14 = vcmp.eq.s32.totalorder %v468_v11, 2 }
  0x7b   : > { %vm1204_vm15 = vcmp.lt.s32.totalorder %v1203_v19, 0 }
  0x7c   : > { %v549_v22 = vsel %vm1204_vm15, 0, %v1203_v19  ;;  %v443_v28 = vclz %v1198_v23  ;;  %vm680_vm13 = vcmp.eq.s32.totalorder %v675_v10, 2  ;;  %vm677_vm15 = vcmp.eq.s32.totalorder %v675_v10, 0 }
  0x7d   : > { %v550_v24 = vsub.s32 32, %v549_v22  ;;  %v551_v25 = vshll.u32 %v542_v12, %v549_v22  ;;  %v554_v26 = vsub.s32 4294967266, %v549_v22 }
  0x7e   : > { %v1199_v33 = vadd.s32 4294967294, %v443_v28 }
  0x7f   : > { %v552_v29 = vshrl.u32 %v534_v21, %v550_v24  ;;  %v555_v31 = vadd.s32 127, %v554_v26 }
  0x80   : > { %vm1200_vm1 = vcmp.lt.s32.totalorder %v1199_v33, 0 }
  0x81   : > { %v553_v35 = vor.u32 %v552_v29, %v551_v25  ;;  %v556_v36 = vshll.u32 %v555_v31, 23  ;;  %v446_v40 = vsel %vm1200_vm1, 0, %v1199_v33  ;;  %vm470_vm1 = vcmp.eq.s32.totalorder %v468_v11, 0 }
  0x82   : > { %v447_v42 = vsub.s32 32, %v446_v40  ;;  %v448_v43 = vshll.u32 %v439_v18, %v446_v40  ;;  %v451_v47 = vsub.s32 4294967266, %v446_v40 }
  0x83   : > { %v557_v38 = vor.u32 4788187, %v556_v36  ;;  %v560_v39 = vcvt.s32.f32 %v553_v35 }
  0x84   : > { %v449_v51 = vshrl.u32 %v431_v37, %v447_v42  ;;  %v452_v53 = vadd.s32 127, %v451_v47 }
  0x85   : > { %v558_v50 = vand.u32 2147483647, %v557_v38 }
  0x86   : > { %v450_v52 = vor.u32 %v449_v51, %v448_v43  ;;  %v453_v55 = vshll.u32 %v452_v53, 23 }
  0x87   : > { %v561_v54 = vmul.f32 %v560_v39, %v558_v50 }
  0x88   : > { %v454_v57 = vor.u32 4788187, %v453_v55  ;;  %v457_v45 = vcvt.s32.f32 %v450_v52 }
  0x89   : > { %v562_v56 = vxor.u32 2147483648, %v561_v54 }
  0x8a   : > { %v455_v59 = vand.u32 2147483647, %v454_v57 }
  0x8b   : > { %v563_v49 = vsel %vm480_vm2, %v562_v56, %v561_v54  ;;  %vm676_vm2 = vcmp.lt.s32.totalorder %v675_v10, 2 }
  0x8c   : > { %v566_v46 = vsel %vm479_vm3, %v1645_v30, %v563_v49  ;;  %v458_v60 = vmul.f32 %v457_v45, %v455_v59  ;;  %vm469_vm3 = vcmp.lt.s32.totalorder %v468_v11, 2 }
  0x8d   : > { %1355 = vcosq.f32 %v566_v46 }
  0x8e   : > { %1357 = vsinq.f32 %v566_v46  ;;  %v459_v62 = vxor.u32 2147483648, %v458_v60 }
  0x90   : > { %v460_v63 = vsel %vm377_vm4, %v459_v62, %v458_v60  ;;  %vm467_vm4 = vweird.f32 %v1642_v27 }
  0x91   : > { %v463_v1 = vsel %vm376_vm5, %v1642_v27, %v460_v63  ;;  %v790_v27 = vld [vmem:[%s1815_s3 + $0x8] sm:$0xff]  ;;  %vm873_vm5 = vcmask 64512  }
  0x92   : > { %1359 = vcosq.f32 %v463_v1 }
  0x93   : > { %1361 = vsinq.f32 %v463_v1 }
  0x9a   : > { %v1356_v5 = vpop.eup %1355 }
  0x9b   : > { %v1358_v7 = vpop.eup %1357  ;;  %v577_v8 = vxor.u32 2147483648, %v1356_v5 }
  0x9c   : > { %v574_v9 = vxor.u32 2147483648, %v1358_v7 }
  0x9d   : > { %v786_v34 = vsel %vm784_vm6, %v577_v8, %v1358_v7  ;;  %v578_v16 = vsel %vm576_vm11, %v577_v8, %v1358_v7 }
  0x9e   : > { %v783_v12 = vsel %vm781_vm7, %v1356_v5, %v574_v9  ;;  %v575_v15 = vsel %vm573_vm10, %v1356_v5, %v574_v9 }
  0x9f   : > { %v787_v48 = vsel %vm780_vm8, %v783_v12, %v786_v34  ;;  %v1360_v14 = vpop.eup %1359  ;;  %v579_v21 = vsel %vm572_vm12, %v575_v15, %v578_v16 }
  0xa0   : > { %v788_v13 = vsel %vm570_vm9, nan, %v787_v48  ;;  %v1362_v17 = vpop.eup %1361  ;;  %v474_v18 = vxor.u32 2147483648, %v1360_v14  ;;  %v580_v29 = vsel %vm570_vm9, nan, %v579_v21 }
  0xa1   : > { %1238 = vmatprep.subr.mxu0 %v788_v13  ;;  %v471_v19 = vxor.u32 2147483648, %v1362_v17 }
  0xa2   : > { %1239 = vmatpush3.msra.mxu0 %v788_v13  ;;  %v682_v20 = vsel %vm680_vm13, %v474_v18, %v1362_v17  ;;  %v475_v22 = vsel %vm473_vm14, %v474_v18, %v1362_v17 }
  0xa3   : > { %v679_v23 = vsel %vm677_vm15, %v1360_v14, %v471_v19  ;;  %v472_v24 = vsel %vm470_vm1, %v1360_v14, %v471_v19 }
  0xa4   : > { %v683_v25 = vsel %vm676_vm2, %v679_v23, %v682_v20  ;;  %v476_v26 = vsel %vm469_vm3, %v472_v24, %v475_v22 }
  0xa5   : > { %v684_v28 = vsel %vm467_vm4, nan, %v683_v25  ;;  %v477_v31 = vsel %vm467_vm4, nan, %v476_v26 }
  0xa6   : > { %1240 = vmatprep.subr.mxu0 %v684_v28 }
  0xa7   : > { %1241 = vmatpush3.msra.mxu0 %v684_v28 }
  0xa8   : > { %1242 = vmatprep.subr.mxu0 %v580_v29 }
  0xa9   : > { %1243 = vmatpush3.msra.mxu0 %v580_v29 }
  0xaa   : > { %1244 = vmatprep.subr.mxu0 %v477_v31 }
  0xab   : > { %1245 = vmatpush3.msra.mxu0 %v477_v31 }
  0xac   : > { %1247 = vmatmul.mubr.msk.f32.vlgmr.msra.gmra.mxu0 %vm791_vm0, %v790_v27 }
 0x16c   : > { %v1248_v33 = vpop.f32.mrf.mxu0 }
 0x16d   : > { %v877_v30 = vsel %vm873_vm5, %v1248_v33, -inf }
 0x16e   : > { %v864_v35 = vpop.f32.mrf.mxu0 }
 0x16f   : > { %v874_v36 = vsel %vm873_vm5, %v864_v35, -inf }
 0x170   : > { %875 = vmax.xlane.f32.xlu0 %v874_v36 }
 0x174   : > { %878 = vmax.xlane.f32.xlu0 %v877_v30 }
 0x1f9   : > { %v876_v37 = vpop.xlane.xlu0 %875 }
 0x1fa   : > { %v880_v38 = vsub.f32 %v864_v35, %v876_v37 }
 0x1fc   : > { %v882_v39 = vmul.f32 1.442695, %v880_v38 }
 0x1fd   : > { %v879_v40 = vpop.xlane.xlu0 %878 }
 0x1fe   : > { %1363 = vpow2.f32 %v882_v39  ;;  %v881_v42 = vsub.f32 %v1248_v33, %v879_v40 }
 0x200   : > { %v884_v43 = vmul.f32 1.442695, %v881_v42 }
 0x202   : > { %1365 = vpow2.f32 %v884_v43 }
 0x20b   : > { %v1364_v47 = vpop.eup %1363 }
 0x20c   : > { %v886_v50 = vsel %vm873_vm5, %v1364_v47, 0.0 }
 0x20d   : > { %887 = vadd.xlane.f32.xlu1 %v886_v50 }
 0x20f   : > { %v1366_v51 = vpop.eup %1365 }
 0x210   : > { %v889_v53 = vsel %vm873_vm5, %v1366_v51, 0.0 }
 0x211   : > { %890 = vadd.xlane.f32.xlu1 %v889_v53 }
 0x296   : > { %v888_v54 = vpop.xlane.xlu1 %887 }
 0x297   : > { %1367 = vrcp.f32 %v888_v54 }
 0x29a   : > { %v891_v44 = vpop.xlane.xlu1 %890 }
 0x29b   : > { %1369 = vrcp.f32 %v891_v44 }
 0x2a4   : > { %v1368_v52 = vpop.eup %1367 }
 0x2a5   : > { %v894_v55 = vmul.f32 %v1368_v52, %v1364_v47 }
 0x2a7   : > { %896 = vst.msk [vmem:[#allocation2] sm:$0xff] %vm873_vm5, %v894_v55 }
 0x2a8   : > { %v1370_v56 = vpop.eup %1369 }
 0x2a9   : > { %v895_v57 = vmul.f32 %v1370_v56, %v1366_v51 }
 0x2ab   : > { %897 = vst.msk [vmem:[#allocation2 + $0x8] sm:$0xff] %vm873_vm5, %v895_v57 }
 0x2ac PF: > { %v898_v45 = vld [vmem:[%s1623_s7] sm:$0xf]  ;;  %vm906_vm0 = vcmask 1043456   ;;  %v1492_v41 = vmov 0.0   ;;  %vm1493_vm6 = vmmov 0   ;;  %vm902_vm7 = vcmask 64512  }
 0x2ad   : > { %1249 = vmatprep.subr.bf16.mxu0 %v1492_v41  ;;  %v908_v46 = vsel %vm906_vm0, %v898_v45, 0  ;;  %1251 = vmatprep.mubr.msk.bf16.mxu0 %vm1493_vm6, %v1492_v41  ;;  %v1373_v58 = vld [vmem:[%s1628_s23] sm:$0xff]   ;;  %vm990_vm8 = vcmask 130048   ;;  %v958_v61 = vld [vmem:[%s1633_s25 + $0x10] sm:$0xff]  ;;  %v1494_v32 = vmov 0   ;;  %v959_v63 = vld [vmem:[%s1633_s25 + $0x18] sm:$0xff] }
 0x2ae   : > { %v899_v49 = vld [vmem:[#allocation2] sm:$0xff]  ;;  %1250 = vmatpush3.bf16.msra.mxu0 %v908_v46  ;;  %1257 = vmatprep.mubr.msk.bf16.mxu1 %vm990_vm8, %v1373_v58  ;;  %v957_v0 = vld [vmem:[%s1633_s25 + $0x8] sm:$0xff]  ;;  %s1221_s7 = sshll.u32 %s1469_s29, 3  ;;  %s1065_s21 = sshll.u32 %s1635_s10, 4  ;;  %s1755_s21 = int_to_ptr.vmem [resolvable:$true] %s1065_s21 }
 0x2af   : > { %v956_v62 = vld [vmem:[%s1633_s25] sm:$0xff]  ;;  %1372 = vset.pattern.permute.xlu1 %v1494_v32  ;;  %1371 = vset.pattern.permute.xlu0 %v1494_v32  ;;  %v1374_v6 = vld [vmem:[%s1628_s23 + $0x8] sm:$0xff]   ;;  %s1062_s19 = sadd.s32 %s1465_s28, %s1221_s7  ;;  %s1833_s9 = sand.u32 1, %s1457_s27  }
 0x2b0   : > { %972 = vperm.xlu1 %1372, %v958_v61   ;;  %962 = vperm.xlu0 %1371, %v956_v62   ;;  %s1222_s20 = sshll.u32 %s1062_s19, 7  ;;  %s1761_s16 = scalar_lea.sflag [#allocation6], %s1833_s9 }
 0x2b1   : > { %s1753_s28 = scalar_lea.hbm %s1818_s6, %s1222_s20  ;;  %s1387_s17 = scalar_lea.vmem %s1755_s21, 512 }
 0x2b2   : > { %v900_v59 = vld [vmem:[#allocation2 + $0x8] sm:$0xff]  ;;  %p1388_p9 = scmp.ne.s32.totalorder %s1755_s21, %s1387_s17  ;;  %s1495_s18 = smov [#allocation5]  }
 0x2b3   : > { %v901_v60 = vpack.c.bf16 %v900_v59, %v899_v49  ;;  %s1391_s23 = sshll.u32 %s1495_s18, 4  ;;  %s1392_s23 = int_to_ptr.vmem [resolvable:$false] %s1391_s23 }
 0x2b4   : > { %977 = vperm.xlu1 %1372, %v959_v63   ;;  %967 = vperm.xlu0 %1371, %v957_v0   ;;  %p1389_p10 = pnand %p1388_p9, %p1588_p8  ;;  %s1393_s24 = scalar_lea.vmem %s1392_s23, 1024 }
 0x2b5   : > { %1252 = vmatmul.mubr.msk.bf16.vlgmr.msra.gmra.mxu0 %vm902_vm7, %v901_v60  ;;  %p1394_p12 = scmp.lt.s32.totalorder %s1755_s21, %s1392_s23  ;;  %p1395_p0 = scmp.lt.s32.totalorder %s1393_s24, %s1387_s17 }
 0x2b6   : > { %p1390_p11 = pneg %p1389_p10 }
 0x2b7   : > { %p1396_p1 = por %p1395_p0, %p1394_p12 }
 0x2b9   : > { %p1397_p2 = pnand %p1396_p1, %p1390_p11 }
 0x32b   : > { %v973_v7 = vpop.permute.xlu1 %972  ;;  %v963_v8 = vpop.permute.xlu0 %962 }
 0x32f   : > { %v978_v12 = vpop.permute.xlu1 %977  ;;  %v968_v14 = vpop.permute.xlu0 %967 }
 0x375   : > { %v944_v1 = vpop.f32.mrf.mxu0 }
 0x377   : > { %v1253_v2 = vpop.f32.mrf.mxu0 }
 0x379   : > { %v947_v3 = vpop.f32.mrf.mxu0 }
 0x37a   : > { %v955_v4 = vpack.c.bf16 %v947_v3, %v944_v1 }
 0x37b   : > { %v1254_v5 = vpop.f32.mrf.mxu0 }
 0x37c   : > { %1255 = vmatprep.subr.bf16.mxu1 %v955_v4 }
 0x37d   : > { %1256 = vmatpush3.bf16.msra.mxu1 %v955_v4 }
 0x380   : > { %1258 = vmatmul.mubr.msk.bf16.vlgmr.msra.gmra.mxu1 %vm990_vm8, %v1374_v6 }
 0x440   : > { %v1259_v9 = vpop.f32.mrf.mxu1 }
 0x441   : > { %v1040_v34 = vadd.f32 %v1259_v9, %v973_v7 }
 0x442   : > { %v1031_v10 = vpop.f32.mrf.mxu1 }
 0x443   : > { %1048 = vst [vmem:[%s1635_s10 + $0x10] sm:$0xff] %v1040_v34  ;;  %v1032_v11 = vadd.f32 %v1031_v10, %v963_v8 }
 0x444   : > { %v1260_v48 = vpop.f32.mrf.mxu1 }
 0x445   : > { %1046 = vst [vmem:[%s1635_s10] sm:$0xff] %v1032_v11  ;;  %v1043_v13 = vadd.f32 %v1260_v48, %v978_v12 }
 0x446   : > { %v1034_v15 = vpop.f32.mrf.mxu1 }
 0x447   : > { %1049 = vst [vmem:[%s1635_s10 + $0x18] sm:$0xff] %v1043_v13  ;;  %v1035_v16 = vadd.f32 %v1034_v15, %v968_v14 }
 0x449   : > { %1047 = vst [vmem:[%s1635_s10 + $0x8] sm:$0xff] %v1035_v16 }
 0x44a   : > { %1400 = shalt.err (!%p1397_p2)
}
 0x44b   : > { %s1401_s13 = scalar_lea.hbm %s1753_s28, 512  ;;  %s1405_s11 = scalar_lea.hbm %s1818_s6, 2048 }
 0x44c   : > { %p1402_p3 = scmp.ne.s32.totalorder %s1753_s28, %s1401_s13  ;;  %p1406_p6 = scmp.lt.s32.totalorder %s1753_s28, %s1818_s6 }
 0x44d   : > { %p1407_p7 = scmp.lt.s32.totalorder %s1405_s11, %s1401_s13 }
 0x44e   : > { %p1403_p4 = pnand %p1402_p3, %p1588_p8 }
 0x44f   : > { %p1408_p9 = por %p1407_p7, %p1406_p6 }
 0x450   : > { %p1404_p5 = pneg %p1403_p4 }
 0x452   : > { %p1409_p10 = pnand %p1408_p9, %p1404_p5 }
 0x454   : > { %1412 = shalt.err (!%p1409_p10)
}
 0x455   : > { %s1496_s30 = smov 128   ;;  %s1497_s7 = smov 256  }
 0x456   : > { %s1498_s19 = smov 8  }
 0x457   : > { %1269 = dma.vmem_to_hbm [thread:$0]  (%p1588_p8), %s1755_s21, 512, %s1753_s28, %s1761_s16, %s1496_s30, %s1497_s7, %s1498_s19  }
 0x458 PF: > { %p1275_p11 = scmp.ge.s32.totalorder %s1481_s8, 2  ;;  %s1080_s20 = sand.u32 1, %s1453_s26  }
 0x459   : > { %s1081_s22 = scalar_lea.sflag [#allocation6], %s1080_s20 }
 0x45a   : > { %p1272_p12 = pnand %p1275_p11, %p1597_p13 }
 0x45c   : > { %p1273_p0 = pneg %p1272_p12 }
 0x45e   : > { %1448 = dma.done.wait (%p1273_p0), %s1081_s22, 512  }
 0x45f   : > { %1450 = vsyncadd (%p1273_p0), %s1081_s22, 4294966784  ;;  %s25_s8 = sadd.s32 1, %s1481_s8   ;;  %s1834_s29 = sld [smem:[#allocation9_spill]] }
 0x460   : > { %p22_p1 = scmp.ge.s32.totalorder %s25_s8, 6   ;;  %s1835_s0 = sld [smem:[#allocation14_spill]] }
 0x461   : > { %s1836_s28 = sld [smem:[#allocation10_spill]]  ;;  %s1840_s26 = smov %s1457_s27 }
 0x462   : > { %s1837_s14 = sld [smem:[#allocation11_spill]] }
 0x463   : > { %s1838_s30 = sld [smem:[#allocation12_spill]] }
 0x464   : > { %s1839_s7 = sld [smem:[#allocation13_spill]]  ;;  %24 = sbr.rel (!%p22_p1) target bundleno = 20 (0x14), region = 88 }
 0x465   : > { %s1841_s27 = smov %s1834_s29 }
 0x468   : > { %s1842_s29 = smov %s1837_s14 }
 0x469   :  { %1086 = vsyncpa [#allocation6], 1 }
 0x46a   :  { %1088 = vsyncpa [#allocation6 + $0x1], 1 }

</bundles_post_ra>
